<compile_context>
chip_gen: v7x
topology: tpu7x:2x2x1
jax: 0.10.0
libtpu: 0.0.40
codegen_flags: <defaults>
</compile_context>

<pallas_src>
import jax
import jax.numpy as jnp
from jax.experimental import pallas as pl
from jax.experimental.pallas import tpu as pltpu


def _logreg_kernel(x_ref, w_ref, b_ref, o_ref):
    # (TM, F) @ (F, 1) on the MXU with f32 accumulation, + scalar bias, sigmoid.
    logits = jnp.dot(
        x_ref[...], w_ref[...], preferred_element_type=jnp.float32
    )
    logits = logits + b_ref[0, 0]               # scalar bias from SMEM
    o_ref[...] = jax.nn.sigmoid(logits).astype(o_ref.dtype)


def _round_up(n, m):
    return ((n + m - 1) // m) * m


def _pick_tile_m(batch, num_features, vmem_budget_bytes=16 * 1024 * 1024):
    """Batch-tile rows: biggest multiple of 8 whose double-buffered x tile
    stays under the VMEM budget (safe for v7x's 64 MiB VMEM / 32 MiB scoped
    default), capped at 1024 rows and at the (8-rounded) batch size."""
    tm = vmem_budget_bytes // (num_features * 4 * 2)   # f32, double-buffered
    tm = max(8, min(1024, (tm // 8) * 8))
    tm = min(tm, _round_up(batch, 8))
    return tm


def neural_logistic_regression(x, weight, bias):
    """x: (B, F) f32; weight: (F, 1) f32; bias: (1, 1) f32 -> (B, 1) f32."""
    B, F = x.shape
    tm = _pick_tile_m(B, F)
    b_pad = _round_up(B, tm)
    if b_pad != B:
        x = jnp.pad(x, ((0, b_pad - B), (0, 0)))
    grid = (b_pad // tm,)

    out = pl.pallas_call(
        _logreg_kernel,
        out_shape=jax.ShapeDtypeStruct((b_pad, 1), jnp.float32),
        grid_spec=pl.GridSpec(
            grid=grid,
            in_specs=[
                # x: one (tm, F) batch tile per grid step (pipelined).
                pl.BlockSpec((tm, F), lambda i: (i, 0)),
                # weight: full (F, 1), VMEM-resident across the whole grid.
                pl.BlockSpec((F, 1), lambda i: (0, 0)),
                # bias: tiny scalar table in SMEM.
                pl.BlockSpec(memory_space=pltpu.MemorySpace.SMEM),
            ],
            out_specs=pl.BlockSpec((tm, 1), lambda i: (i, 0)),
        ),
        compiler_params=pltpu.CompilerParams(
            dimension_semantics=("parallel",),
        ),
        cost_estimate=pl.CostEstimate(
            flops=2 * b_pad * F,
            transcendentals=b_pad,                      # one exp per row (sigmoid)
            bytes_accessed=4 * (b_pad * F + F + b_pad + 1),
        ),
    )(x, weight, bias)

    return out[:B]


if __name__ == "__main__":
    # Small, deterministic synthetic setup.
    # NUM_FEATURES stands in for len(vectorizer.get_feature_names()).
    BATCH = 8
    NUM_FEATURES = 256

    key = jax.random.PRNGKey(0)
    kx, kw, kb = jax.random.split(key, 3)

    # Deterministic "TF-IDF-like" non-negative features.
    x = jax.random.uniform(kx, (BATCH, NUM_FEATURES), dtype=jnp.float32)

    # torch.nn.Linear(NUM_FEATURES, 1) init: U(-1/sqrt(F), 1/sqrt(F))
    bound = 1.0 / jnp.sqrt(jnp.float32(NUM_FEATURES))
    weight = jax.random.uniform(
        kw, (NUM_FEATURES, 1), dtype=jnp.float32, minval=-bound, maxval=bound
    )
    bias = jax.random.uniform(
        kb, (1, 1), dtype=jnp.float32, minval=-bound, maxval=bound
    )

    y = neural_logistic_regression(x, weight, bias)
    y = jax.block_until_ready(y)

    # Reference check in plain JAX.
    y_ref = jax.nn.sigmoid(x @ weight + bias)
    assert y.shape == (BATCH, 1)
    assert jnp.allclose(y, y_ref, atol=1e-5), "mismatch vs reference"

    print("KERNEL_OK")
</pallas_src>

<mosaic_0001>
module attributes {stable_mosaic.version = 11 : i64} {
  func.func @_logreg_kernel(%arg0: i32, %arg1: memref<8x256xf32, #tpu.memory_space<vmem>>, %arg2: memref<256x1xf32, #tpu.memory_space<vmem>>, %arg3: memref<1x1xf32, #tpu.memory_space<smem>>, %arg4: memref<8x1xf32, #tpu.memory_space<vmem>>) attributes {dimension_semantics = [#tpu.dimension_semantics<parallel>], iteration_bounds = array<i64: 1>, scalar_prefetch = 0 : i64, scratch_operands = 0 : i64, tpu.core_type = #tpu.core_type<tc>, window_params = [{transform_indices = @transform_0, window_bounds = array<i64: 8, 256>}, {pipeline_mode = #tpu.pipeline_mode<synchronous>, transform_indices = @transform_1, window_bounds = array<i64: 256, 1>}, {transform_indices = @transform_2, window_bounds = array<i64: 1, 1>}, {transform_indices = @transform_3, window_bounds = array<i64: 8, 1>}]} {
    %c0 = arith.constant 0 : index
    %c0_0 = arith.constant 0 : index
    %0 = vector.load %arg1[%c0, %c0_0] : memref<8x256xf32, #tpu.memory_space<vmem>>, vector<8x256xf32>
    %c0_1 = arith.constant 0 : index
    %c0_2 = arith.constant 0 : index
    %1 = vector.load %arg2[%c0_1, %c0_2] : memref<256x1xf32, #tpu.memory_space<vmem>>, vector<256x1xf32>
    %cst = arith.constant dense<0.000000e+00> : vector<8x1xf32>
    %2 = tpu.matmul %0, %1, %cst {dimension_numbers = #tpu.dot_dimension_numbers<[1], [0], [0], [1], [0, 0, 1, 1], [], []>} : vector<8x256xf32>, vector<256x1xf32>, vector<8x1xf32> -> vector<8x1xf32>
    %c0_3 = arith.constant 0 : index
    %c0_4 = arith.constant 0 : index
    %3 = memref.load %arg3[%c0_3, %c0_4] : memref<1x1xf32, #tpu.memory_space<smem>>
    %4 = vector.broadcast %3 : f32 to vector<8x1xf32>
    %5 = arith.addf %2, %4 : vector<8x1xf32>
    %6 = arith.negf %5 : vector<8x1xf32>
    %7 = math.exp %6 : vector<8x1xf32>
    %cst_5 = arith.constant 1.000000e+00 : f32
    %8 = vector.broadcast %cst_5 : f32 to vector<8x1xf32>
    %9 = arith.addf %8, %7 : vector<8x1xf32>
    %10 = arith.divf %8, %9 : vector<8x1xf32>
    %c0_6 = arith.constant 0 : index
    %c0_7 = arith.constant 0 : index
    %11 = vector.load %arg4[%c0_6, %c0_7] : memref<8x1xf32, #tpu.memory_space<vmem>>, vector<8x1xf32>
    tpu.vector_store %arg4[%c0_6, %c0_7], %10 {strides = array<i32>} : memref<8x1xf32, #tpu.memory_space<vmem>>, vector<8x1xf32>,
    return
  }
  func.func @transform_0(%arg0: i32) -> (i32, i32) {
    %c0_i32 = arith.constant 0 : i32
    %c0_i32_0 = arith.constant 0 : i32
    return %arg0, %c0_i32 : i32, i32
  }
  func.func @transform_1(%arg0: i32) -> (i32, i32) {
    %c0_i32 = arith.constant 0 : i32
    %c0_i32_0 = arith.constant 0 : i32
    %c0_i32_1 = arith.constant 0 : i32
    return %c0_i32, %c0_i32_0 : i32, i32
  }
  func.func @transform_2(%arg0: i32) -> (i32, i32) {
    %c0_i32 = arith.constant 0 : i32
    %c0_i32_0 = arith.constant 0 : i32
    %c0_i32_1 = arith.constant 0 : i32
    return %c0_i32, %c0_i32_0 : i32, i32
  }
  func.func @transform_3(%arg0: i32) -> (i32, i32) {
    %c0_i32 = arith.constant 0 : i32
    %c0_i32_0 = arith.constant 0 : i32
    return %arg0, %c0_i32 : i32, i32
  }
}

</mosaic_0001>

<bundles_post_ra>
// kernel: tpu_custom_call.1
= control target key start
LH: loop header
LB: loop body
LE: loop exit
PB: predicated region body
PF: predicated region fallthrough
CT: control target
= control target key end

     0   :  { %vm127_vm0 = vcmask 7168   ;;  %s333_s1 = inlined_call_operand.vmem [shape: f32[256,1], index: 1, kind: input, shape index: {}]   ;;  %s334_s0 = inlined_call_operand.vmem [shape: f32[8,256], index: 0, kind: input, shape index: {}]   ;;  %s335_s2 = inlined_call_operand.<no memory space> [shape: f32[1,1], index: 2, kind: input, shape index: {}]   ;;  %s336_s3 = inlined_call_operand.vmem [shape: f32[8,1], index: 3, kind: output, shape index: {}]  }
   0x1   :  { %v33_v0 = vld [vmem:[%s333_s1 + $0x80] sm:$0xff]  ;;  %v34_v1 = vld [vmem:[%s333_s1 + $0x88] sm:$0xff]  ;;  %v35_v5 = vld [vmem:[%s333_s1 + $0x90] sm:$0xff]  ;;  %v50_v51 = vstv %s335_s2 }
   0x2   :  { %v17_v2 = vld [vmem:[%s333_s1] sm:$0xff]  ;;  %v169_v3 = vpack.c.bf16 %v34_v1, %v33_v0  ;;  %v18_v4 = vld [vmem:[%s333_s1 + $0x8] sm:$0xff]  ;;  %v36_v6 = vld [vmem:[%s333_s1 + $0x98] sm:$0xff] }
   0x3   :  { %v171_v7 = vpack.c.bf16 %v18_v4, %v17_v2  ;;  %v173_v8 = vpack.c.bf16 %v36_v6, %v35_v5  ;;  %v19_v9 = vld [vmem:[%s333_s1 + $0x10] sm:$0xff]  ;;  %v20_v10 = vld [vmem:[%s333_s1 + $0x18] sm:$0xff]  ;;  %v37_v11 = vld [vmem:[%s333_s1 + $0xa0] sm:$0xff] }
   0x4   :  { %170 = vmatprep.subr.bf16.mxu0 %v169_v3  ;;  %v38_v12 = vld [vmem:[%s333_s1 + $0xa8] sm:$0xff]  ;;  %v175_v13 = vpack.c.bf16 %v20_v10, %v19_v9  ;;  %v21_v15 = vld [vmem:[%s333_s1 + $0x20] sm:$0xff]  ;;  %v39_v17 = vld [vmem:[%s333_s1 + $0xb0] sm:$0xff] }
   0x5   :  { %172 = vmatpush3.bf16.msra.mxu0 %v171_v7  ;;  %v177_v14 = vpack.c.bf16 %v38_v12, %v37_v11  ;;  %v22_v16 = vld [vmem:[%s333_s1 + $0x28] sm:$0xff]  ;;  %v40_v18 = vld [vmem:[%s333_s1 + $0xb8] sm:$0xff]  ;;  %v23_v21 = vld [vmem:[%s333_s1 + $0x30] sm:$0xff] }
   0x6   :  { %174 = vmatprep.subr.bf16.mxu0 %v173_v8  ;;  %v179_v19 = vpack.c.bf16 %v22_v16, %v21_v15  ;;  %v181_v20 = vpack.c.bf16 %v40_v18, %v39_v17  ;;  %v24_v22 = vld [vmem:[%s333_s1 + $0x38] sm:$0xff]  ;;  %v41_v23 = vld [vmem:[%s333_s1 + $0xc0] sm:$0xff]  ;;  %v42_v24 = vld [vmem:[%s333_s1 + $0xc8] sm:$0xff] }
   0x7   :  { %v16_v25 = vld [vmem:[%s334_s0 + $0x8] sm:$0xff]  ;;  %v183_v26 = vpack.c.bf16 %v24_v22, %v23_v21  ;;  %v185_v27 = vpack.c.bf16 %v42_v24, %v41_v23  ;;  %v25_v28 = vld [vmem:[%s333_s1 + $0x40] sm:$0xff]  ;;  %v43_v30 = vld [vmem:[%s333_s1 + $0xd0] sm:$0xff] }
   0x8   :  { %115 = vmatprep.mubr.f32.mxu0 %v16_v25  ;;  %v26_v29 = vld [vmem:[%s333_s1 + $0x48] sm:$0xff]  ;;  %v44_v31 = vld [vmem:[%s333_s1 + $0xd8] sm:$0xff]  ;;  %v27_v34 = vld [vmem:[%s333_s1 + $0x50] sm:$0xff] }
   0x9   :  { %176 = vmatpush3.bf16.msra.mxu0 %v175_v13  ;;  %v187_v32 = vpack.c.bf16 %v26_v29, %v25_v28  ;;  %v189_v33 = vpack.c.bf16 %v44_v31, %v43_v30  ;;  %v28_v35 = vld [vmem:[%s333_s1 + $0x58] sm:$0xff]  ;;  %v45_v36 = vld [vmem:[%s333_s1 + $0xe0] sm:$0xff]  ;;  %v46_v37 = vld [vmem:[%s333_s1 + $0xe8] sm:$0xff] }
   0xa   :  { %178 = vmatprep.subr.bf16.mxu0 %v177_v14  ;;  %v191_v38 = vpack.c.bf16 %v28_v35, %v27_v34  ;;  %v193_v39 = vpack.c.bf16 %v46_v37, %v45_v36  ;;  %v29_v40 = vld [vmem:[%s333_s1 + $0x60] sm:$0xff]  ;;  %v30_v41 = vld [vmem:[%s333_s1 + $0x68] sm:$0xff]  ;;  %v47_v42 = vld [vmem:[%s333_s1 + $0xf0] sm:$0xff] }
   0xb   :  { %v48_v43 = vld [vmem:[%s333_s1 + $0xf8] sm:$0xff]  ;;  %v195_v44 = vpack.c.bf16 %v30_v41, %v29_v40  ;;  %v31_v46 = vld [vmem:[%s333_s1 + $0x70] sm:$0xff]  ;;  %v15_v49 = vld [vmem:[%s334_s0] sm:$0xff] }
   0xc   :  { %v197_v45 = vpack.c.bf16 %v48_v43, %v47_v42  ;;  %v32_v47 = vld [vmem:[%s333_s1 + $0x78] sm:$0xff] }
   0xd   :  { %180 = vmatpush3.bf16.msra.mxu0 %v179_v19  ;;  %v199_v48 = vpack.c.bf16 %v32_v47, %v31_v46 }
   0xe   :  { %182 = vmatprep.subr.bf16.mxu0 %v181_v20 }
  0x11   :  { %184 = vmatpush3.bf16.msra.mxu0 %v183_v26 }
  0x12   :  { %186 = vmatprep.subr.bf16.mxu0 %v185_v27 }
  0x15   :  { %188 = vmatpush3.bf16.msra.mxu0 %v187_v32 }
  0x16   :  { %190 = vmatprep.subr.bf16.mxu0 %v189_v33 }
  0x19   :  { %192 = vmatpush3.bf16.msra.mxu0 %v191_v38 }
  0x1a   :  { %194 = vmatprep.subr.bf16.mxu0 %v193_v39 }
  0x1d   :  { %196 = vmatpush3.bf16.msra.mxu0 %v195_v44 }
  0x1e   :  { %198 = vmatprep.subr.bf16.mxu0 %v197_v45 }
  0x21   :  { %200 = vmatpush3.bf16.msra.mxu0 %v199_v48 }
  0x24   :  { %116 = vmatmul.mubr.f32.vlgmr.msra.gmra.mrb[0].mxu0 %v15_v49 }
  0xf7   :  { %v166_v50 = vpop.f32.mrb[0].mxu0 }
  0xf8   :  { %v167_v52 = vpop.f32.mrb[1].mxu0 }
  0xf9   :  { %v168_v53 = vadd.f32 %v167_v52, %v166_v50 }
  0xfb   :  { %v118_v54 = vadd.f32 %v168_v53, %v50_v51 }
  0xfd   :  { %v133_v55 = vmul.f32 -1.442695, %v118_v54 }
  0xff   :  { %201 = vpow2.f32 %v133_v55 }
 0x109   :  { %v202_v56 = vpop.eup %201 }
 0x10a   :  { %v124_v57 = vadd.f32 1.0, %v202_v56 }
 0x10c   :  { %203 = vrcp.f32 %v124_v57 }
 0x116   :  { %v204_v58 = vpop.eup %203 }
 0x117   :  { %128 = vst.msk [vmem:[%s336_s3] sm:$0xff] %vm127_vm0, %v204_v58 }

</bundles_post_ra>
